<compile_context>
chip_gen: v5e
topology: v5e:2x2
jax: 0.10.0
libtpu: 0.0.40
codegen_flags: <defaults>
</compile_context>

<pallas_src>
import functools

import jax
import jax.numpy as jnp
from jax.experimental import pallas as pl
from jax.experimental.pallas import tpu as pltpu

EPS = 1e-5  # PyTorch BatchNorm2d default eps


# ----------------------------- activation ---------------------------------- #

def _act(y, act):
    if act == "relu":
        return jnp.maximum(y, 0.0)
    if act == "leaky_relu":
        return jnp.where(y > 0, y, 0.01 * y)      # PyTorch default slope
    if act == "gelu":
        return jax.nn.gelu(y, approximate=False)  # PyTorch nn.GELU default
    raise ValueError(act)


# ----------------------------- Pallas kernel ------------------------------- #

def fused_forward_kernel(p1_ref, w1_ref, s1_ref, w2_ref, s2_ref, o_ref, *,
                         act, plan, n_batch):
    """Whole SmallNetwork forward in one kernel invocation (all VMEM).

    p1_ref : (4, Hp*Wp*N, K1) bf16  conv1 im2col patches, grouped by pool win.
    w1_ref : (K1, 64)        bf16   conv1 weight with BN1 scale folded in.
    s1_ref : (1, 64)         f32    BN1 shift.
    w2_ref : (T, 64, 256)    bf16   conv2 per-tap weights (BN2 scale folded).
    s2_ref : (1, 256)        f32    conv2 bias + BN2 shift.
    o_ref  : (Ho2*Wo2*N, 256) f32   output rows ordered (oh, ow, n).
    plan   : static tuple; per conv2 output position, tuple of
             (tap_slot, pooled_row_start) pairs for the statically valid taps.
    """
    s1 = s1_ref[...]
    # Conv1 (+BN1) + activation for the 4 positions of each 2x2 maxpool
    # window, fused with the pool's elementwise max.
    pooled = None
    for k in range(p1_ref.shape[0]):
        y = jnp.dot(p1_ref[k], w1_ref[...], preferred_element_type=jnp.float32)
        y = _act(y + s1, act)
        pooled = y if pooled is None else jnp.maximum(pooled, y)
    pooled = pooled.astype(w2_ref.dtype)  # bf16 for the second MXU pass

    # Conv2 (+bias+BN2) + activation: in-kernel im2col as a static sum of
    # per-tap (N, 64) x (64, 256) matmuls; padded taps never enter the plan.
    s2 = s2_ref[...]
    cout = s2.shape[-1]
    for pos, taps in enumerate(plan):
        acc = jnp.zeros((n_batch, cout), jnp.float32)
        for slot, row0 in taps:
            rows = pooled[row0:row0 + n_batch, :]
            acc = acc + jnp.dot(rows, w2_ref[slot],
                                preferred_element_type=jnp.float32)
        o_ref[pl.ds(pos * n_batch, n_batch), :] = (
            _act(acc + s2, act).astype(o_ref.dtype))


# ------------------------------ JAX wrapper -------------------------------- #

def conv1_pool_patches(x_nhwc, kh, kw, stride, pad):
    """Conv1 im2col with rows grouped by 2x2 maxpool window.

    Returns (p, Hp, Wp): p has shape (4, Hp*Wp*N, kh*kw*Cin); leading dim is
    the (dh, dw) position inside the pool window, rows are ordered (ph, pw, n).
    MaxPool floor mode is handled by only enumerating complete windows.
    """
    xp = jnp.pad(x_nhwc, ((0, 0), (pad, pad), (pad, pad), (0, 0)))
    N, H, W, C = xp.shape
    Ho = (H - kh) // stride + 1
    Wo = (W - kw) // stride + 1
    cols = []
    for i in range(kh):
        for j in range(kw):
            cols.append(xp[:, i:i + stride * Ho:stride,
                           j:j + stride * Wo:stride, :])
    patches = jnp.stack(cols, axis=3).reshape(N, Ho, Wo, kh * kw * C)
    Hp, Wp = Ho // 2, Wo // 2
    subs = []
    for dh in range(2):
        for dw in range(2):
            s = patches[:, dh:dh + 2 * Hp:2, dw:dw + 2 * Wp:2, :]  # (N,Hp,Wp,K)
            subs.append(jnp.transpose(s, (1, 2, 0, 3)).reshape(Hp * Wp * N, -1))
    return jnp.stack(subs, axis=0), Hp, Wp


def small_network_forward(x_nchw, params, act="relu"):
    """Fused inference forward of SmallNetwork.  Input NCHW, output NCHW."""
    N = x_nchw.shape[0]
    x = jnp.transpose(x_nchw, (0, 2, 3, 1))  # NHWC

    # Fold BN1 into conv1 (bias-free) and BN2 + conv2 bias into conv2.
    scale1 = params["bn1_gamma"] * jax.lax.rsqrt(params["bn1_var"] + EPS)
    shift1 = params["bn1_beta"] - params["bn1_mean"] * scale1
    w1_mat = (jnp.transpose(params["w1"], (2, 3, 1, 0)).reshape(-1, 64)
              * scale1[None, :])                                   # (K1, 64)
    scale2 = params["bn2_gamma"] * jax.lax.rsqrt(params["bn2_var"] + EPS)
    shift2 = params["bn2_beta"] + (params["b2"] - params["bn2_mean"]) * scale2
    w2_all = jnp.transpose(params["w2"], (2, 3, 1, 0)) * scale2    # (5,5,64,256)

    # Conv1 im2col (tiny XLA prelude), grouped by maxpool window.
    p1, Hp, Wp = conv1_pool_patches(x, 7, 7, 4, 3)

    # Static conv2 tap plan (trace-time Python; shapes are static under jit).
    KH2 = KW2 = 5
    S2, P2 = 4, 2
    Ho2 = (Hp + 2 * P2 - KH2) // S2 + 1
    Wo2 = (Wp + 2 * P2 - KW2) // S2 + 1
    tap_slot, valid_taps, plan = {}, [], []
    for oh in range(Ho2):
        for ow in range(Wo2):
            taps = []
            for kh in range(KH2):
                for kw in range(KW2):
                    ih, iw = oh * S2 - P2 + kh, ow * S2 - P2 + kw
                    if 0 <= ih < Hp and 0 <= iw < Wp:
                        key = (kh, kw)
                        if key not in tap_slot:
                            tap_slot[key] = len(valid_taps)
                            valid_taps.append(key)
                        taps.append((tap_slot[key], (ih * Wp + iw) * N))
            plan.append(tuple(taps))
    w2_taps = jnp.stack([w2_all[kh, kw] for kh, kw in valid_taps], axis=0)

    # bf16 MXU operands; f32 accumulation + epilogue inside the kernel.
    p1 = p1.astype(jnp.bfloat16)
    w1_mat = w1_mat.astype(jnp.bfloat16)
    w2_taps = w2_taps.astype(jnp.bfloat16)
    shift1 = shift1.reshape(1, -1).astype(jnp.float32)
    shift2 = shift2.reshape(1, -1).astype(jnp.float32)

    M2 = Ho2 * Wo2 * N
    vmem_spec = pl.BlockSpec(memory_space=pltpu.MemorySpace.VMEM)
    out = pl.pallas_call(
        functools.partial(fused_forward_kernel, act=act,
                          plan=tuple(plan), n_batch=N),
        out_shape=jax.ShapeDtypeStruct((M2, 256), jnp.float32),
        in_specs=[vmem_spec] * 5,
        out_specs=vmem_spec,
    )(p1, w1_mat, shift1, w2_taps, shift2)

    # Rows are (oh, ow, n) -> NCHW.
    out = out.reshape(Ho2, Wo2, N, 256)
    return jnp.transpose(out, (2, 3, 0, 1))


# ------------------------- pure-JAX reference (f32) ------------------------ #

def reference_forward(x_nchw, params, act="relu"):
    scale1 = params["bn1_gamma"] * jax.lax.rsqrt(params["bn1_var"] + EPS)
    shift1 = params["bn1_beta"] - params["bn1_mean"] * scale1
    y = jax.lax.conv_general_dilated(
        x_nchw, params["w1"], window_strides=(4, 4), padding=((3, 3), (3, 3)),
        dimension_numbers=("NCHW", "OIHW", "NCHW"))
    y = _act(y * scale1[None, :, None, None] + shift1[None, :, None, None], act)
    N, C, H, W = y.shape
    y = y[:, :, :(H // 2) * 2, :(W // 2) * 2]
    y = y.reshape(N, C, H // 2, 2, W // 2, 2).max(axis=(3, 5))
    scale2 = params["bn2_gamma"] * jax.lax.rsqrt(params["bn2_var"] + EPS)
    shift2 = params["bn2_beta"] + (params["b2"] - params["bn2_mean"]) * scale2
    y = jax.lax.conv_general_dilated(
        y, params["w2"], window_strides=(4, 4), padding=((2, 2), (2, 2)),
        dimension_numbers=("NCHW", "OIHW", "NCHW"))
    return _act(y * scale2[None, :, None, None] + shift2[None, :, None, None], act)


# --------------------------------- params ---------------------------------- #

def init_params(key, z_dim):
    """Deterministic synthetic params matching the PyTorch module's init."""
    k1, k2, k3 = jax.random.split(key, 3)
    fan1 = z_dim * 7 * 7
    w1 = jax.random.normal(k1, (64, z_dim, 7, 7), jnp.float32) * jnp.sqrt(2.0 / fan1)
    fan2 = 64 * 5 * 5
    w2 = jax.random.normal(k2, (256, 64, 5, 5), jnp.float32) * jnp.sqrt(2.0 / fan2)
    bound = 1.0 / jnp.sqrt(float(fan2))
    b2 = jax.random.uniform(k3, (256,), jnp.float32, -bound, bound)
    return dict(
        w1=w1,
        bn1_gamma=jnp.ones((64,), jnp.float32), bn1_beta=jnp.zeros((64,), jnp.float32),
        bn1_mean=jnp.zeros((64,), jnp.float32), bn1_var=jnp.ones((64,), jnp.float32),
        w2=w2, b2=b2,
        bn2_gamma=jnp.ones((256,), jnp.float32), bn2_beta=jnp.zeros((256,), jnp.float32),
        bn2_mean=jnp.zeros((256,), jnp.float32), bn2_var=jnp.ones((256,), jnp.float32),
    )


if __name__ == "__main__":
    z_dim = 4
    key = jax.random.PRNGKey(0)
    kx, kp = jax.random.split(key)
    x = jax.random.normal(kx, (2, z_dim, 32, 32), jnp.float32)  # NCHW input
    params = init_params(kp, z_dim)

    fwd = jax.jit(functools.partial(small_network_forward, act="relu"))
    out = jax.block_until_ready(fwd(x, params))

    # 32 -> conv1(s4) 8 -> pool 4 -> conv2(s4) 1 ; channels 4 -> 64 -> 256
    assert out.shape == (2, 256, 1, 1), out.shape
    assert out.dtype == jnp.float32
    assert bool(jnp.all(jnp.isfinite(out)))

    ref = jax.block_until_ready(
        jax.jit(functools.partial(reference_forward, act="relu"))(x, params))
    assert bool(jnp.allclose(out, ref, atol=1e-1, rtol=1e-1)), (
        "max abs diff vs reference: %f" % float(jnp.max(jnp.abs(out - ref))))

    print("KERNEL_OK")
</pallas_src>

<mosaic_0001>
module attributes {stable_mosaic.version = 11 : i64} {
  func.func @fused_forward_kernel(%arg0: memref<4x32x196xbf16, #tpu.memory_space<vmem>>, %arg1: memref<196x64xbf16, #tpu.memory_space<vmem>>, %arg2: memref<1x64xf32, #tpu.memory_space<vmem>>, %arg3: memref<9x64x256xbf16, #tpu.memory_space<vmem>>, %arg4: memref<1x256xf32, #tpu.memory_space<vmem>>, %arg5: memref<2x256xf32, #tpu.memory_space<vmem>>) attributes {dimension_semantics = [], scalar_prefetch = 0 : i64, scratch_operands = 0 : i64, tpu.core_type = #tpu.core_type<tc>} {
    %c0 = arith.constant 0 : index
    %c0_0 = arith.constant 0 : index
    %0 = vector.load %arg2[%c0, %c0_0] : memref<1x64xf32, #tpu.memory_space<vmem>>, vector<1x64xf32>
    %c0_1 = arith.constant 0 : index
    %c0_2 = arith.constant 0 : index
    %c0_3 = arith.constant 0 : index
    %1 = vector.load %arg0[%c0_1, %c0_2, %c0_3] : memref<4x32x196xbf16, #tpu.memory_space<vmem>>, vector<1x32x196xbf16>
    %2 = vector.shape_cast %1 : vector<1x32x196xbf16> to vector<32x196xbf16>
    %c0_4 = arith.constant 0 : index
    %c0_5 = arith.constant 0 : index
    %3 = vector.load %arg1[%c0_4, %c0_5] : memref<196x64xbf16, #tpu.memory_space<vmem>>, vector<196x64xbf16>
    %cst = arith.constant dense<0.000000e+00> : vector<32x64xf32>
    %4 = tpu.matmul %2, %3, %cst {dimension_numbers = #tpu.dot_dimension_numbers<[1], [0], [0], [1], [0, 0, 1, 1], [], []>} : vector<32x196xbf16>, vector<196x64xbf16>, vector<32x64xf32> -> vector<32x64xf32>
    %5 = vector.broadcast %0 : vector<1x64xf32> to vector<32x64xf32>
    %6 = arith.addf %4, %5 : vector<32x64xf32>
    %cst_6 = arith.constant 0.000000e+00 : f32
    %7 = vector.broadcast %cst_6 : f32 to vector<32x64xf32>
    %8 = arith.maximumf %6, %7 : vector<32x64xf32>
    %c1 = arith.constant 1 : index
    %c0_7 = arith.constant 0 : index
    %c0_8 = arith.constant 0 : index
    %9 = vector.load %arg0[%c1, %c0_7, %c0_8] : memref<4x32x196xbf16, #tpu.memory_space<vmem>>, vector<1x32x196xbf16>
    %10 = vector.shape_cast %9 : vector<1x32x196xbf16> to vector<32x196xbf16>
    %c0_9 = arith.constant 0 : index
    %c0_10 = arith.constant 0 : index
    %11 = vector.load %arg1[%c0_9, %c0_10] : memref<196x64xbf16, #tpu.memory_space<vmem>>, vector<196x64xbf16>
    %cst_11 = arith.constant dense<0.000000e+00> : vector<32x64xf32>
    %12 = tpu.matmul %10, %11, %cst_11 {dimension_numbers = #tpu.dot_dimension_numbers<[1], [0], [0], [1], [0, 0, 1, 1], [], []>} : vector<32x196xbf16>, vector<196x64xbf16>, vector<32x64xf32> -> vector<32x64xf32>
    %13 = vector.broadcast %0 : vector<1x64xf32> to vector<32x64xf32>
    %14 = arith.addf %12, %13 : vector<32x64xf32>
    %cst_12 = arith.constant 0.000000e+00 : f32
    %15 = vector.broadcast %cst_12 : f32 to vector<32x64xf32>
    %16 = arith.maximumf %14, %15 : vector<32x64xf32>
    %17 = arith.maximumf %8, %16 : vector<32x64xf32>
    %c2 = arith.constant 2 : index
    %c0_13 = arith.constant 0 : index
    %c0_14 = arith.constant 0 : index
    %18 = vector.load %arg0[%c2, %c0_13, %c0_14] : memref<4x32x196xbf16, #tpu.memory_space<vmem>>, vector<1x32x196xbf16>
    %19 = vector.shape_cast %18 : vector<1x32x196xbf16> to vector<32x196xbf16>
    %c0_15 = arith.constant 0 : index
    %c0_16 = arith.constant 0 : index
    %20 = vector.load %arg1[%c0_15, %c0_16] : memref<196x64xbf16, #tpu.memory_space<vmem>>, vector<196x64xbf16>
    %cst_17 = arith.constant dense<0.000000e+00> : vector<32x64xf32>
    %21 = tpu.matmul %19, %20, %cst_17 {dimension_numbers = #tpu.dot_dimension_numbers<[1], [0], [0], [1], [0, 0, 1, 1], [], []>} : vector<32x196xbf16>, vector<196x64xbf16>, vector<32x64xf32> -> vector<32x64xf32>
    %22 = vector.broadcast %0 : vector<1x64xf32> to vector<32x64xf32>
    %23 = arith.addf %21, %22 : vector<32x64xf32>
    %cst_18 = arith.constant 0.000000e+00 : f32
    %24 = vector.broadcast %cst_18 : f32 to vector<32x64xf32>
    %25 = arith.maximumf %23, %24 : vector<32x64xf32>
    %26 = arith.maximumf %17, %25 : vector<32x64xf32>
    %c3 = arith.constant 3 : index
    %c0_19 = arith.constant 0 : index
    %c0_20 = arith.constant 0 : index
    %27 = vector.load %arg0[%c3, %c0_19, %c0_20] : memref<4x32x196xbf16, #tpu.memory_space<vmem>>, vector<1x32x196xbf16>
    %28 = vector.shape_cast %27 : vector<1x32x196xbf16> to vector<32x196xbf16>
    %c0_21 = arith.constant 0 : index
    %c0_22 = arith.constant 0 : index
    %29 = vector.load %arg1[%c0_21, %c0_22] : memref<196x64xbf16, #tpu.memory_space<vmem>>, vector<196x64xbf16>
    %cst_23 = arith.constant dense<0.000000e+00> : vector<32x64xf32>
    %30 = tpu.matmul %28, %29, %cst_23 {dimension_numbers = #tpu.dot_dimension_numbers<[1], [0], [0], [1], [0, 0, 1, 1], [], []>} : vector<32x196xbf16>, vector<196x64xbf16>, vector<32x64xf32> -> vector<32x64xf32>
    %31 = vector.broadcast %0 : vector<1x64xf32> to vector<32x64xf32>
    %32 = arith.addf %30, %31 : vector<32x64xf32>
    %cst_24 = arith.constant 0.000000e+00 : f32
    %33 = vector.broadcast %cst_24 : f32 to vector<32x64xf32>
    %34 = arith.maximumf %32, %33 : vector<32x64xf32>
    %35 = arith.maximumf %26, %34 : vector<32x64xf32>
    %36 = arith.truncf %35 : vector<32x64xf32> to vector<32x64xbf16>
    %c0_25 = arith.constant 0 : index
    %c0_26 = arith.constant 0 : index
    %37 = vector.load %arg4[%c0_25, %c0_26] : memref<1x256xf32, #tpu.memory_space<vmem>>, vector<1x256xf32>
    %cst_27 = arith.constant 0.000000e+00 : f32
    %38 = vector.broadcast %cst_27 : f32 to vector<2x256xf32>
    %39 = vector.extract_strided_slice %36 {offsets = [0, 0], sizes = [2, 64], strides = [1, 1]} : vector<32x64xbf16> to vector<2x64xbf16>
    %c0_28 = arith.constant 0 : index
    %c0_29 = arith.constant 0 : index
    %c0_30 = arith.constant 0 : index
    %40 = vector.load %arg3[%c0_28, %c0_29, %c0_30] : memref<9x64x256xbf16, #tpu.memory_space<vmem>>, vector<1x64x256xbf16>
    %41 = vector.shape_cast %40 : vector<1x64x256xbf16> to vector<64x256xbf16>
    %cst_31 = arith.constant dense<0.000000e+00> : vector<2x256xf32>
    %42 = tpu.matmul %39, %41, %cst_31 {dimension_numbers = #tpu.dot_dimension_numbers<[1], [0], [0], [1], [0, 0, 1, 1], [], []>} : vector<2x64xbf16>, vector<64x256xbf16>, vector<2x256xf32> -> vector<2x256xf32>
    %43 = arith.addf %38, %42 : vector<2x256xf32>
    %44 = vector.extract_strided_slice %36 {offsets = [2, 0], sizes = [2, 64], strides = [1, 1]} : vector<32x64xbf16> to vector<2x64xbf16>
    %c1_32 = arith.constant 1 : index
    %c0_33 = arith.constant 0 : index
    %c0_34 = arith.constant 0 : index
    %45 = vector.load %arg3[%c1_32, %c0_33, %c0_34] : memref<9x64x256xbf16, #tpu.memory_space<vmem>>, vector<1x64x256xbf16>
    %46 = vector.shape_cast %45 : vector<1x64x256xbf16> to vector<64x256xbf16>
    %cst_35 = arith.constant dense<0.000000e+00> : vector<2x256xf32>
    %47 = tpu.matmul %44, %46, %cst_35 {dimension_numbers = #tpu.dot_dimension_numbers<[1], [0], [0], [1], [0, 0, 1, 1], [], []>} : vector<2x64xbf16>, vector<64x256xbf16>, vector<2x256xf32> -> vector<2x256xf32>
    %48 = arith.addf %43, %47 : vector<2x256xf32>
    %49 = vector.extract_strided_slice %36 {offsets = [4, 0], sizes = [2, 64], strides = [1, 1]} : vector<32x64xbf16> to vector<2x64xbf16>
    %c2_36 = arith.constant 2 : index
    %c0_37 = arith.constant 0 : index
    %c0_38 = arith.constant 0 : index
    %50 = vector.load %arg3[%c2_36, %c0_37, %c0_38] : memref<9x64x256xbf16, #tpu.memory_space<vmem>>, vector<1x64x256xbf16>
    %51 = vector.shape_cast %50 : vector<1x64x256xbf16> to vector<64x256xbf16>
    %cst_39 = arith.constant dense<0.000000e+00> : vector<2x256xf32>
    %52 = tpu.matmul %49, %51, %cst_39 {dimension_numbers = #tpu.dot_dimension_numbers<[1], [0], [0], [1], [0, 0, 1, 1], [], []>} : vector<2x64xbf16>, vector<64x256xbf16>, vector<2x256xf32> -> vector<2x256xf32>
    %53 = arith.addf %48, %52 : vector<2x256xf32>
    %54 = vector.extract_strided_slice %36 {offsets = [8, 0], sizes = [2, 64], strides = [1, 1]} : vector<32x64xbf16> to vector<2x64xbf16>
    %c3_40 = arith.constant 3 : index
    %c0_41 = arith.constant 0 : index
    %c0_42 = arith.constant 0 : index
    %55 = vector.load %arg3[%c3_40, %c0_41, %c0_42] : memref<9x64x256xbf16, #tpu.memory_space<vmem>>, vector<1x64x256xbf16>
    %56 = vector.shape_cast %55 : vector<1x64x256xbf16> to vector<64x256xbf16>
    %cst_43 = arith.constant dense<0.000000e+00> : vector<2x256xf32>
    %57 = tpu.matmul %54, %56, %cst_43 {dimension_numbers = #tpu.dot_dimension_numbers<[1], [0], [0], [1], [0, 0, 1, 1], [], []>} : vector<2x64xbf16>, vector<64x256xbf16>, vector<2x256xf32> -> vector<2x256xf32>
    %58 = arith.addf %53, %57 : vector<2x256xf32>
    %59 = vector.extract_strided_slice %36 {offsets = [10, 0], sizes = [2, 64], strides = [1, 1]} : vector<32x64xbf16> to vector<2x64xbf16>
    %c4 = arith.constant 4 : index
    %c0_44 = arith.constant 0 : index
    %c0_45 = arith.constant 0 : index
    %60 = vector.load %arg3[%c4, %c0_44, %c0_45] : memref<9x64x256xbf16, #tpu.memory_space<vmem>>, vector<1x64x256xbf16>
    %61 = vector.shape_cast %60 : vector<1x64x256xbf16> to vector<64x256xbf16>
    %cst_46 = arith.constant dense<0.000000e+00> : vector<2x256xf32>
    %62 = tpu.matmul %59, %61, %cst_46 {dimension_numbers = #tpu.dot_dimension_numbers<[1], [0], [0], [1], [0, 0, 1, 1], [], []>} : vector<2x64xbf16>, vector<64x256xbf16>, vector<2x256xf32> -> vector<2x256xf32>
    %63 = arith.addf %58, %62 : vector<2x256xf32>
    %64 = vector.extract_strided_slice %36 {offsets = [12, 0], sizes = [2, 64], strides = [1, 1]} : vector<32x64xbf16> to vector<2x64xbf16>
    %c5 = arith.constant 5 : index
    %c0_47 = arith.constant 0 : index
    %c0_48 = arith.constant 0 : index
    %65 = vector.load %arg3[%c5, %c0_47, %c0_48] : memref<9x64x256xbf16, #tpu.memory_space<vmem>>, vector<1x64x256xbf16>
    %66 = vector.shape_cast %65 : vector<1x64x256xbf16> to vector<64x256xbf16>
    %cst_49 = arith.constant dense<0.000000e+00> : vector<2x256xf32>
    %67 = tpu.matmul %64, %66, %cst_49 {dimension_numbers = #tpu.dot_dimension_numbers<[1], [0], [0], [1], [0, 0, 1, 1], [], []>} : vector<2x64xbf16>, vector<64x256xbf16>, vector<2x256xf32> -> vector<2x256xf32>
    %68 = arith.addf %63, %67 : vector<2x256xf32>
    %69 = vector.extract_strided_slice %36 {offsets = [16, 0], sizes = [2, 64], strides = [1, 1]} : vector<32x64xbf16> to vector<2x64xbf16>
    %c6 = arith.constant 6 : index
    %c0_50 = arith.constant 0 : index
    %c0_51 = arith.constant 0 : index
    %70 = vector.load %arg3[%c6, %c0_50, %c0_51] : memref<9x64x256xbf16, #tpu.memory_space<vmem>>, vector<1x64x256xbf16>
    %71 = vector.shape_cast %70 : vector<1x64x256xbf16> to vector<64x256xbf16>
    %cst_52 = arith.constant dense<0.000000e+00> : vector<2x256xf32>
    %72 = tpu.matmul %69, %71, %cst_52 {dimension_numbers = #tpu.dot_dimension_numbers<[1], [0], [0], [1], [0, 0, 1, 1], [], []>} : vector<2x64xbf16>, vector<64x256xbf16>, vector<2x256xf32> -> vector<2x256xf32>
    %73 = arith.addf %68, %72 : vector<2x256xf32>
    %74 = vector.extract_strided_slice %36 {offsets = [18, 0], sizes = [2, 64], strides = [1, 1]} : vector<32x64xbf16> to vector<2x64xbf16>
    %c7 = arith.constant 7 : index
    %c0_53 = arith.constant 0 : index
    %c0_54 = arith.constant 0 : index
    %75 = vector.load %arg3[%c7, %c0_53, %c0_54] : memref<9x64x256xbf16, #tpu.memory_space<vmem>>, vector<1x64x256xbf16>
    %76 = vector.shape_cast %75 : vector<1x64x256xbf16> to vector<64x256xbf16>
    %cst_55 = arith.constant dense<0.000000e+00> : vector<2x256xf32>
    %77 = tpu.matmul %74, %76, %cst_55 {dimension_numbers = #tpu.dot_dimension_numbers<[1], [0], [0], [1], [0, 0, 1, 1], [], []>} : vector<2x64xbf16>, vector<64x256xbf16>, vector<2x256xf32> -> vector<2x256xf32>
    %78 = arith.addf %73, %77 : vector<2x256xf32>
    %79 = vector.extract_strided_slice %36 {offsets = [20, 0], sizes = [2, 64], strides = [1, 1]} : vector<32x64xbf16> to vector<2x64xbf16>
    %c8 = arith.constant 8 : index
    %c0_56 = arith.constant 0 : index
    %c0_57 = arith.constant 0 : index
    %80 = vector.load %arg3[%c8, %c0_56, %c0_57] : memref<9x64x256xbf16, #tpu.memory_space<vmem>>, vector<1x64x256xbf16>
    %81 = vector.shape_cast %80 : vector<1x64x256xbf16> to vector<64x256xbf16>
    %cst_58 = arith.constant dense<0.000000e+00> : vector<2x256xf32>
    %82 = tpu.matmul %79, %81, %cst_58 {dimension_numbers = #tpu.dot_dimension_numbers<[1], [0], [0], [1], [0, 0, 1, 1], [], []>} : vector<2x64xbf16>, vector<64x256xbf16>, vector<2x256xf32> -> vector<2x256xf32>
    %83 = arith.addf %78, %82 : vector<2x256xf32>
    %84 = vector.broadcast %37 : vector<1x256xf32> to vector<2x256xf32>
    %85 = arith.addf %83, %84 : vector<2x256xf32>
    %cst_59 = arith.constant 0.000000e+00 : f32
    %86 = vector.broadcast %cst_59 : f32 to vector<2x256xf32>
    %87 = arith.maximumf %85, %86 : vector<2x256xf32>
    %c0_60 = arith.constant 0 : index
    %c0_61 = arith.constant 0 : index
    %88 = vector.load %arg5[%c0_60, %c0_61] : memref<2x256xf32, #tpu.memory_space<vmem>>, vector<2x256xf32>
    tpu.vector_store %arg5[%c0_60, %c0_61], %87 {strides = array<i32>} : memref<2x256xf32, #tpu.memory_space<vmem>>, vector<2x256xf32>,
    return
  }
}

</mosaic_0001>

<bundles_post_ra>
// kernel: small_network_forward.1
= control target key start
LH: loop header
LB: loop body
LE: loop exit
PB: predicated region body
PF: predicated region fallthrough
CT: control target
= control target key end

     0   :  { %vm154_vm0 = vcmask 1041408   ;;  %vm147_vm1 = vcmask 556032   ;;  %vm475_vm2 = vcmask 523264   ;;  %s2538_s1 = inlined_call_operand.vmem [shape: bf16[196,64], index: 1, kind: input, shape index: {}]   ;;  %s2539_s0 = inlined_call_operand.vmem [shape: bf16[4,32,196], index: 0, kind: input, shape index: {}]   ;;  %s2540_s2 = inlined_call_operand.vmem [shape: f32[1,64], index: 2, kind: input, shape index: {}]   ;;  %s2541_s3 = inlined_call_operand.vmem [shape: bf16[9,64,256], index: 3, kind: input, shape index: {}]   ;;  %s2542_s4 = inlined_call_operand.vmem [shape: f32[1,256], index: 4, kind: input, shape index: {}]   ;;  %s2543_s5 = inlined_call_operand.vmem [shape: f32[2,256], index: 5, kind: output, shape index: {}]  }
   0x1   :  { %v1800_v0 = vld [vmem:[%s2538_s1 + $0x38] sm:$0xff]  ;;  %v50_v1 = vld [vmem:[%s2538_s1 + $0x60] sm:$0x3]  ;;  %v1810_v3 = vld [vmem:[%s2538_s1 + $0x30] sm:$0xff] }
   0x2   :  { %v121_v2 = vunpack.c.l.b16 %v50_v1  ;;  %158 = vmatpush.bf16.msra.mxu0 %v1800_v0  ;;  %226 = vmatpush.bf16.msra.mxu2 %v1800_v0  ;;  %v1817_v6 = vld [vmem:[%s2538_s1 + $0x58] sm:$0xff]  ;;  %v1822_v7 = vld [vmem:[%s2538_s1 + $0x28] sm:$0xff]  ;;  %v1830_v8 = vld [vmem:[%s2538_s1 + $0x50] sm:$0xff] }
   0x3   :  { %v1835_v9 = vld [vmem:[%s2538_s1 + $0x20] sm:$0xff]  ;;  %v1844_v10 = vld [vmem:[%s2538_s1 + $0x48] sm:$0xff]  ;;  %v1849_v11 = vld [vmem:[%s2538_s1 + $0x18] sm:$0xff] }
   0x4   :  { %v134_v4 = vpack.c.b16 %v121_v2, %v121_v2  ;;  %v1856_v12 = vld [vmem:[%s2538_s1 + $0x40] sm:$0xff]  ;;  %v1863_v13 = vld [vmem:[%s2538_s1 + $0x10] sm:$0xff]  ;;  %v1238_v15 = vld [vmem:[%s2539_s0 + $0x28] sm:$0xf0] }
   0x5   :  { %v1682_v14 = vld [vmem:[%s2539_s0 + $0x24] sm:$0xf]  ;;  %v1168_v17 = vld [vmem:[%s2539_s0 + $0x8] sm:$0xf0]  ;;  %v1166_v22 = vld [vmem:[%s2539_s0] sm:$0xf] }
   0x6   :  { %v156_v5 = vsel %vm154_vm0, %v134_v4, 0  ;;  %159 = vmatpush.bf16.msra.mxu0 %v1810_v3  ;;  %227 = vmatpush.bf16.msra.mxu2 %v1810_v3  ;;  %v1666_v16 = vld [vmem:[%s2539_s0 + $0x4] sm:$0xf]  ;;  %v1241_v18 = vor.u32 %v1682_v14, %v1238_v15  ;;  %v1884_v19 = vld [vmem:[%s2538_s1 + $0x8] sm:$0xff]  ;;  %v1236_v24 = vld [vmem:[%s2539_s0 + $0x20] sm:$0xf] }
   0x7   :  { %247 = vmatpush.bf16.msra.mxu3 %v156_v5  ;;  %179 = vmatpush.bf16.msra.mxu1 %v156_v5  ;;  %v1171_v20 = vor.u32 %v1666_v16, %v1168_v17  ;;  %v1670_v21 = vld [vmem:[%s2538_s1] sm:$0xff]  ;;  %v1667_v23 = vld [vmem:[%s2539_s0 + $0x4] sm:$0xf0]  ;;  %v1684_v28 = vld [vmem:[%s2539_s0 + $0x34] sm:$0xf] }
   0x8   :  { %v1683_v25 = vld [vmem:[%s2539_s0 + $0x24] sm:$0xf0]  ;;  %v1167_v26 = vor.u32 %v1667_v23, %v1166_v22  ;;  %v1246_v29 = vld [vmem:[%s2539_s0 + $0x38] sm:$0xf0]  ;;  %v1668_v30 = vld [vmem:[%s2539_s0 + $0x14] sm:$0xf] }
   0x9   :  { %v1237_v27 = vor.u32 %v1683_v25, %v1236_v24  ;;  %v1176_v31 = vld [vmem:[%s2539_s0 + $0x18] sm:$0xf0]  ;;  %v1249_v32 = vor.u32 %v1684_v28, %v1246_v29  ;;  %v1174_v34 = vld [vmem:[%s2539_s0 + $0x10] sm:$0xf]  ;;  %v1669_v35 = vld [vmem:[%s2539_s0 + $0x14] sm:$0xf0] }
   0xa   :  { %160 = vmatpush.bf16.msra.mxu0 %v1822_v7  ;;  %228 = vmatpush.bf16.msra.mxu2 %v1822_v7  ;;  %v1179_v33 = vor.u32 %v1668_v30, %v1176_v31  ;;  %v1244_v36 = vld [vmem:[%s2539_s0 + $0x30] sm:$0xf]  ;;  %v1685_v37 = vld [vmem:[%s2539_s0 + $0x34] sm:$0xf0]  ;;  %v1175_v38 = vor.u32 %v1669_v35, %v1174_v34  ;;  %v1686_v40 = vld [vmem:[%s2539_s0 + $0x44] sm:$0xf] }
   0xb   :  { %248 = vmatpush.bf16.msra.mxu3 %v1817_v6  ;;  %180 = vmatpush.bf16.msra.mxu1 %v1817_v6  ;;  %v1245_v39 = vor.u32 %v1685_v37, %v1244_v36  ;;  %v1260_v41 = vld [vmem:[%s2539_s0 + $0x48] sm:$0xf0]  ;;  %v1258_v42 = vld [vmem:[%s2539_s0 + $0x40] sm:$0xf]  ;;  %v1687_v43 = vld [vmem:[%s2539_s0 + $0x44] sm:$0xf0] }
   0xc   :  { %v1263_v44 = vor.u32 %v1686_v40, %v1260_v41  ;;  %v1259_v45 = vor.u32 %v1687_v43, %v1258_v42  ;;  %v1280_v46 = vld [vmem:[%s2539_s0 + $0x60] sm:$0xf]  ;;  %v1691_v47 = vld [vmem:[%s2539_s0 + $0x64] sm:$0xf0]  ;;  %v1690_v48 = vld [vmem:[%s2539_s0 + $0x64] sm:$0xf] }
   0xd   :  { %v1282_v49 = vld [vmem:[%s2539_s0 + $0x68] sm:$0xf0]  ;;  %v1281_v50 = vor.u32 %v1691_v47, %v1280_v46  ;;  %v1688_v52 = vld [vmem:[%s2539_s0 + $0x54] sm:$0xf]  ;;  %v1268_v53 = vld [vmem:[%s2539_s0 + $0x58] sm:$0xf0] }
   0xe   :  { %161 = vmatpush.bf16.msra.mxu0 %v1835_v9  ;;  %229 = vmatpush.bf16.msra.mxu2 %v1835_v9  ;;  %v1285_v51 = vor.u32 %v1690_v48, %v1282_v49  ;;  %v1266_v54 = vld [vmem:[%s2539_s0 + $0x50] sm:$0xf]  ;;  %v1689_v55 = vld [vmem:[%s2539_s0 + $0x54] sm:$0xf0]  ;;  %v1271_v56 = vor.u32 %v1688_v52, %v1268_v53  ;;  %v1692_v60 = vld [vmem:[%s2539_s0 + $0x74] sm:$0xf] }
   0xf   :  { %249 = vmatpush.bf16.msra.mxu3 %v1830_v8  ;;  %181 = vmatpush.bf16.msra.mxu1 %v1830_v8  ;;  %v1267_v57 = vor.u32 %v1689_v55, %v1266_v54  ;;  %v1288_v58 = vld [vmem:[%s2539_s0 + $0x70] sm:$0xf]  ;;  %v1693_v59 = vld [vmem:[%s2539_s0 + $0x74] sm:$0xf0]  ;;  %v1290_v61 = vld [vmem:[%s2539_s0 + $0x78] sm:$0xf0] }
  0x10   :  { %v1289_v62 = vor.u32 %v1693_v59, %v1288_v58  ;;  %v1293_v63 = vor.u32 %v1692_v60, %v1290_v61  ;;  %v1332_v1 = vld [vmem:[%s2541_s3 + $0x78] sm:$0xf0]  ;;  %v1699_v14 = vld [vmem:[%s2541_s3 + $0x24] sm:$0xf0]  ;;  %v1698_v15 = vld [vmem:[%s2541_s3 + $0x24] sm:$0xf] }
  0x11   :  { %v1330_v16 = vld [vmem:[%s2541_s3 + $0x70] sm:$0xf]  ;;  %v1709_v17 = vld [vmem:[%s2541_s3 + $0x74] sm:$0xf0]  ;;  %v1358_v22 = vld [vmem:[%s2541_s3 + $0x28] sm:$0xf0] }
  0x12   :  { %162 = vmatpush.bf16.msra.mxu0 %v1849_v11  ;;  %230 = vmatpush.bf16.msra.mxu2 %v1849_v11  ;;  %v1361_v24 = vor.u32 %v1698_v15, %v1358_v22  ;;  %v1696_v28 = vld [vmem:[%s2541_s3 + $0x14] sm:$0xf]  ;;  %v1350_v31 = vld [vmem:[%s2541_s3 + $0x18] sm:$0xf0]  ;;  %v1707_v34 = vld [vmem:[%s2541_s3 + $0x64] sm:$0xf0] }
  0x13   :  { %250 = vmatpush.bf16.msra.mxu3 %v1844_v10  ;;  %182 = vmatpush.bf16.msra.mxu1 %v1844_v10  ;;  %v1353_v35 = vor.u32 %v1696_v28, %v1350_v31  ;;  %v1694_v40 = vld [vmem:[%s2541_s3 + $0x4] sm:$0xf]  ;;  %v1704_v41 = vld [vmem:[%s2541_s3 + $0x54] sm:$0xf]  ;;  %v1316_v42 = vld [vmem:[%s2541_s3 + $0x58] sm:$0xf0] }
  0x14   :  { %v1314_v47 = vld [vmem:[%s2541_s3 + $0x50] sm:$0xf]  ;;  %v1705_v48 = vld [vmem:[%s2541_s3 + $0x54] sm:$0xf0]  ;;  %v1724_v53 = vld [vmem:[%s2541_s3 + $0xf4] sm:$0xf] }
  0x15   :  { %v1315_v49 = vor.u32 %v1705_v48, %v1314_v47  ;;  %v1725_v52 = vld [vmem:[%s2541_s3 + $0xf4] sm:$0xf0]  ;;  %v1702_v58 = vld [vmem:[%s2541_s3 + $0x44] sm:$0xf]  ;;  %v1308_v59 = vld [vmem:[%s2541_s3 + $0x48] sm:$0xf0] }
  0x16   :  { %163 = vmatpush.bf16.msra.mxu0 %v1863_v13  ;;  %231 = vmatpush.bf16.msra.mxu2 %v1863_v13  ;;  %v1306_v61 = vld [vmem:[%s2541_s3 + $0x40] sm:$0xf]  ;;  %v1406_v15 = vld [vmem:[%s2541_s3 + $0xb0] sm:$0xf]  ;;  %v1714_v28 = vld [vmem:[%s2541_s3 + $0xa4] sm:$0xf] }
  0x17   :  { %251 = vmatpush.bf16.msra.mxu3 %v1856_v12  ;;  %183 = vmatpush.bf16.msra.mxu1 %v1856_v12  ;;  %v1398_v31 = vld [vmem:[%s2541_s3 + $0xa0] sm:$0xf]  ;;  %v1392_v47 = vld [vmem:[%s2541_s3 + $0x98] sm:$0xf0] }
  0x1a   :  { %1250 = vmatmul.msk.bf16.vlgmr.msra.gmra.mxu3 %vm147_vm1, %v1241_v18  ;;  %164 = vmatpush.bf16.msra.mxu0 %v1884_v19  ;;  %v1706_v18 = vld [vmem:[%s2541_s3 + $0x64] sm:$0xf] }
  0x1b   :  { %297 = vmatpush.bf16.msrb.mxu1 %v1800_v0  ;;  %318 = vmatpush.bf16.msrb.mxu3 %v156_v5 }
  0x1c   :  { %1228 = vmatmul.msk.bf16.vlgmr.msra.gmra.mxu1 %vm147_vm1, %v1171_v20  ;;  %232 = vmatpush.bf16.msra.mxu2 %v1884_v19  ;;  %v1331_v20 = vor.u32 %v1709_v17, %v1330_v16  ;;  %v1717_v16 = vld [vmem:[%s2541_s3 + $0xb4] sm:$0xf0] }
  0x1e   :  { %165 = vmatpush.bf16.msra.mxu0 %v1670_v21 }
  0x1f   :  { %298 = vmatpush.bf16.msrb.mxu1 %v1810_v3  ;;  %319 = vmatpush.bf16.msrb.mxu3 %v1817_v6 }
  0x20   :  { %233 = vmatpush.bf16.msra.mxu2 %v1670_v21 }
  0x21   :  { %166 = vmatmul.bf16.vlgmr.msra.gmra.mxu0 %v1167_v26  ;;  %v1348_v26 = vld [vmem:[%s2541_s3 + $0x10] sm:$0xf] }
  0x22   :  { %368 = vmatpush.bf16.msrb.mxu0 %v1800_v0  ;;  %v1708_v0 = vld [vmem:[%s2541_s3 + $0x74] sm:$0xf] }
  0x23   :  { %299 = vmatpush.bf16.msrb.mxu1 %v1822_v7  ;;  %320 = vmatpush.bf16.msrb.mxu3 %v1830_v8  ;;  %v1335_v2 = vor.u32 %v1708_v0, %v1332_v1  ;;  %v1703_v0 = vld [vmem:[%s2541_s3 + $0x44] sm:$0xf0] }
  0x24   :  { %389 = vmatpush.bf16.msrb.mxu2 %v156_v5  ;;  %v1364_v5 = vld [vmem:[%s2541_s3 + $0x30] sm:$0xf]  ;;  %v1307_v1 = vor.u32 %v1703_v0, %v1306_v61  ;;  %v1384_v61 = vld [vmem:[%s2541_s3 + $0x88] sm:$0xf0] }
  0x25   :  { %234 = vmatmul.bf16.vlgmr.msra.gmra.mxu2 %v1237_v27  ;;  %v1697_v27 = vld [vmem:[%s2541_s3 + $0x14] sm:$0xf0] }
  0x26   :  { %369 = vmatpush.bf16.msrb.mxu0 %v1810_v3  ;;  %v1349_v30 = vor.u32 %v1697_v27, %v1348_v26 }
  0x27   :  { %300 = vmatpush.bf16.msrb.mxu1 %v1835_v9  ;;  %321 = vmatpush.bf16.msrb.mxu3 %v1844_v10 }
  0x28   :  { %390 = vmatpush.bf16.msrb.mxu2 %v1817_v6  ;;  %v1701_v6 = vld [vmem:[%s2541_s3 + $0x34] sm:$0xf0] }
  0x2a   :  { %370 = vmatpush.bf16.msrb.mxu0 %v1822_v7  ;;  %1251 = vmatmul.msk.bf16.gmra.mxu3 %vm147_vm1, %v1249_v32  ;;  %v1700_v7 = vld [vmem:[%s2541_s3 + $0x34] sm:$0xf] }
  0x2b   :  { %301 = vmatpush.bf16.msrb.mxu1 %v1849_v11  ;;  %322 = vmatpush.bf16.msrb.mxu3 %v1856_v12 }
  0x2c   :  { %391 = vmatpush.bf16.msrb.mxu2 %v1830_v8  ;;  %1229 = vmatmul.msk.bf16.gmra.mxu1 %vm147_vm1, %v1179_v33  ;;  %v1365_v8 = vor.u32 %v1701_v6, %v1364_v5  ;;  %v1322_v33 = vld [vmem:[%s2541_s3 + $0x60] sm:$0xf]  ;;  %v1723_v5 = vld [vmem:[%s2541_s3 + $0xe4] sm:$0xf0]  ;;  %v1722_v6 = vld [vmem:[%s2541_s3 + $0xe4] sm:$0xf] }
  0x2d   :  { %v1323_v37 = vor.u32 %v1707_v34, %v1322_v33  ;;  %v2187_v33 = vld [vmem:[%s2540_s2] ss:$0 sm:$0xff] }
  0x2e   :  { %371 = vmatpush.bf16.msrb.mxu0 %v1835_v9  ;;  %v1366_v9 = vld [vmem:[%s2541_s3 + $0x38] sm:$0xf0] }
  0x2f   :  { %302 = vmatpush.bf16.msrb.mxu1 %v1863_v13  ;;  %496 = vmatpush.bf16.msra.mxu3 %v1335_v2  ;;  %v1440_v2 = vld [vmem:[%s2541_s3 + $0xe0] sm:$0xf] }
  0x30   :  { %392 = vmatpush.bf16.msrb.mxu2 %v1844_v10 }
  0x31   :  { %171 = vmatmul.bf16.gmra.mxu0 %v1175_v38  ;;  %v1340_v38 = vld [vmem:[%s2541_s3] sm:$0xf] }
  0x32   :  { %372 = vmatpush.bf16.msrb.mxu0 %v1849_v11  ;;  %v1369_v11 = vor.u32 %v1700_v7, %v1366_v9  ;;  %v1441_v7 = vor.u32 %v1723_v5, %v1440_v2 }
  0x33   :  { %303 = vmatpush.bf16.msrb.mxu1 %v1884_v19 }
  0x34   :  { %393 = vmatpush.bf16.msrb.mxu2 %v1856_v12 }
  0x35   :  { %239 = vmatmul.bf16.gmra.mxu2 %v1245_v39  ;;  %v1695_v39 = vld [vmem:[%s2541_s3 + $0x4] sm:$0xf0] }
  0x36   :  { %373 = vmatpush.bf16.msrb.mxu0 %v1863_v13  ;;  %v1356_v13 = vld [vmem:[%s2541_s3 + $0x20] sm:$0xf]  ;;  %v1341_v43 = vor.u32 %v1695_v39, %v1340_v38 }
  0x37   :  { %304 = vmatpush.bf16.msrb.mxu1 %v1670_v21  ;;  %v1424_v39 = vld [vmem:[%s2541_s3 + $0xc0] sm:$0xf] }
  0x38   :  { %565 = vmatpush.bf16.msra.mxu2 %v1369_v11  ;;  %v1716_v11 = vld [vmem:[%s2541_s3 + $0xb4] sm:$0xf] }
  0x3a   :  { %374 = vmatpush.bf16.msrb.mxu0 %v1884_v19  ;;  %1272 = vmatmul.msk.bf16.vlgmr.msrb.gmra.mxu3 %vm147_vm1, %v1263_v44  ;;  %v1357_v19 = vor.u32 %v1699_v14, %v1356_v13  ;;  %v1342_v44 = vld [vmem:[%s2541_s3 + $0x8] sm:$0xf0]  ;;  %v1408_v13 = vld [vmem:[%s2541_s3 + $0xb8] sm:$0xf0] }
  0x3b   :  { %483 = vmatpush.bf16.msra.mxu1 %v1331_v20  ;;  %v1345_v46 = vor.u32 %v1694_v40, %v1342_v44  ;;  %v1411_v14 = vor.u32 %v1716_v11, %v1408_v13  ;;  %v1721_v20 = vld [vmem:[%s2541_s3 + $0xd4] sm:$0xf0]  ;;  %v1719_v40 = vld [vmem:[%s2541_s3 + $0xc4] sm:$0xf0] }
  0x3c   :  { %305 = vmatmul.bf16.vlgmr.msrb.gmra.mxu1 %v1259_v45  ;;  %566 = vmatpush.bf16.msra.mxu2 %v1361_v24  ;;  %v1319_v45 = vor.u32 %v1704_v41, %v1316_v42  ;;  %v1434_v24 = vld [vmem:[%s2541_s3 + $0xd8] sm:$0xf0]  ;;  %v1718_v41 = vld [vmem:[%s2541_s3 + $0xc4] sm:$0xf]  ;;  %v1425_v42 = vor.u32 %v1719_v40, %v1424_v39  ;;  %v1732_v40 = vld [vmem:[%s2541_s3 + $0x134] sm:$0xf] }
  0x3e   :  { %375 = vmatpush.bf16.msrb.mxu0 %v1670_v21  ;;  %v1324_v21 = vld [vmem:[%s2541_s3 + $0x68] sm:$0xf0] }
  0x3f   :  { %v1327_v23 = vor.u32 %v1706_v18, %v1324_v21  ;;  %484 = vmatpush.bf16.msra.mxu1 %v1323_v37  ;;  %v1407_v18 = vor.u32 %v1717_v16, %v1406_v15  ;;  %v1720_v21 = vld [vmem:[%s2541_s3 + $0xd4] sm:$0xf]  ;;  %v1715_v37 = vld [vmem:[%s2541_s3 + $0xa4] sm:$0xf0] }
  0x40   :  { %567 = vmatpush.bf16.msra.mxu2 %v1353_v35  ;;  %v1437_v27 = vor.u32 %v1720_v21, %v1434_v24  ;;  %v1399_v38 = vor.u32 %v1715_v37, %v1398_v31  ;;  %v1740_v21 = vld [vmem:[%s2541_s3 + $0x174] sm:$0xf]  ;;  %v1739_v37 = vld [vmem:[%s2541_s3 + $0x164] sm:$0xf0] }
  0x41   :  { %376 = vmatmul.bf16.vlgmr.msrb.gmra.mxu0 %v1281_v50  ;;  %497 = vmatpush.bf16.msra.mxu3 %v1327_v23 }
  0x42   :  { %552 = vmatpush.bf16.msra.mxu0 %v1365_v8  ;;  %v1442_v8 = vld [vmem:[%s2541_s3 + $0xe8] sm:$0xf0] }
  0x43   :  { %485 = vmatpush.bf16.msra.mxu1 %v1315_v49  ;;  %v1445_v9 = vor.u32 %v1722_v6, %v1442_v8  ;;  %v1390_v49 = vld [vmem:[%s2541_s3 + $0x90] sm:$0xf] }
  0x44   :  { %568 = vmatpush.bf16.msra.mxu2 %v1345_v46  ;;  %v1712_v46 = vld [vmem:[%s2541_s3 + $0x94] sm:$0xf] }
  0x45   :  { %1294 = vmatmul.msk.bf16.vlgmr.msrb.gmra.mxu2 %vm147_vm1, %v1285_v51  ;;  %498 = vmatpush.bf16.msra.mxu3 %v1319_v45  ;;  %v1448_v51 = vld [vmem:[%s2541_s3 + $0xf0] sm:$0xf]  ;;  %v1395_v48 = vor.u32 %v1712_v46, %v1392_v47  ;;  %v1733_v46 = vld [vmem:[%s2541_s3 + $0x134] sm:$0xf0] }
  0x46   :  { %553 = vmatpush.bf16.msra.mxu0 %v1357_v19  ;;  %v1449_v55 = vor.u32 %v1725_v52, %v1448_v51  ;;  %v1432_v19 = vld [vmem:[%s2541_s3 + $0xd0] sm:$0xf] }
  0x47   :  { %486 = vmatpush.bf16.msra.mxu1 %v1307_v1  ;;  %v1433_v23 = vor.u32 %v1721_v20, %v1432_v19 }
  0x4a   :  { %1273 = vmatmul.msk.bf16.gmra.mxu3 %vm147_vm1, %v1271_v56  ;;  %554 = vmatpush.bf16.msra.mxu0 %v1349_v30  ;;  %v1450_v56 = vld [vmem:[%s2541_s3 + $0xf8] sm:$0xf0]  ;;  %v1400_v30 = vld [vmem:[%s2541_s3 + $0xa8] sm:$0xf0] }
  0x4b   :  { %v1453_v60 = vor.u32 %v1724_v53, %v1450_v56  ;;  %631 = vmatpush.bf16.msrb.mxu1 %v1407_v18  ;;  %v1403_v35 = vor.u32 %v1714_v28, %v1400_v30  ;;  %v1741_v18 = vld [vmem:[%s2541_s3 + $0x174] sm:$0xf0]  ;;  %v1524_v30 = vld [vmem:[%s2541_s3 + $0x160] sm:$0xf] }
  0x4c   :  { %310 = vmatmul.bf16.gmra.mxu1 %v1267_v57 }
  0x4d   :  { %724 = vmatpush.bf16.msrb.mxu2 %v1453_v60  ;;  %v1710_v60 = vld [vmem:[%s2541_s3 + $0x84] sm:$0xf] }
  0x4e   :  { %555 = vmatpush.bf16.msra.mxu0 %v1341_v43  ;;  %v1426_v43 = vld [vmem:[%s2541_s3 + $0xc8] sm:$0xf0] }
  0x4f   :  { %632 = vmatpush.bf16.msrb.mxu1 %v1399_v38  ;;  %v1429_v45 = vor.u32 %v1718_v41, %v1426_v43 }
  0x51   :  { %381 = vmatmul.bf16.gmra.mxu0 %v1289_v62  ;;  %725 = vmatpush.bf16.msrb.mxu2 %v1445_v9 }
  0x52   :  { %711 = vmatpush.bf16.msrb.mxu0 %v1449_v55 }
  0x55   :  { %1295 = vmatmul.msk.bf16.gmra.mxu2 %vm147_vm1, %v1293_v63  ;;  %v1311_v63 = vor.u32 %v1702_v58, %v1308_v59 }
  0x56   :  { %712 = vmatpush.bf16.msrb.mxu0 %v1441_v7  ;;  %726 = vmatpush.bf16.msrb.mxu2 %v1437_v27 }
  0x57   :  { %499 = vmatpush.bf16.msra.mxu3 %v1311_v63  ;;  %v1387_v63 = vor.u32 %v1710_v60, %v1384_v61 }
  0x5a   :  { %713 = vmatpush.bf16.msrb.mxu0 %v1433_v23  ;;  %727 = vmatpush.bf16.msrb.mxu2 %v1429_v45  ;;  %v1492_v45 = vld [vmem:[%s2541_s3 + $0x138] sm:$0xf0] }
  0x5b   :  { %644 = vmatpush.bf16.msrb.mxu3 %v1411_v14  ;;  %v1495_v60 = vor.u32 %v1732_v40, %v1492_v45  ;;  %v1727_v40 = vld [vmem:[%s2541_s3 + $0x104] sm:$0xf0]  ;;  %v1608_v45 = vld [vmem:[%s2541_s3 + $0x1e0] sm:$0xf] }
  0x5e   :  { %714 = vmatpush.bf16.msrb.mxu0 %v1425_v42 }
  0x5f   :  { %645 = vmatpush.bf16.msrb.mxu3 %v1403_v35 }
  0x63   :  { %646 = vmatpush.bf16.msrb.mxu3 %v1395_v48  ;;  %v1525_v48 = vor.u32 %v1739_v37, %v1524_v30  ;;  %v1757_v30 = vld [vmem:[%s2541_s3 + $0x1f4] sm:$0xf0] }
  0x67   :  { %647 = vmatpush.bf16.msrb.mxu3 %v1387_v63 }
  0x99   :  { %v2013_v3 = vpop.f32.mrf.mxu1 }
  0x9d   :  { %v2015_v4 = vpop.f32.mrf.mxu3 }
  0x9e   :  { %v2029_v10 = vpop.f32.mrf.mxu0 }
  0x9f   :  { %v168_v51 = vadd.f32 %v2187_v33, %v2029_v10  ;;  %v1382_v10 = vld [vmem:[%s2541_s3 + $0x80] sm:$0xf] }
  0xa1   :  { %v2031_v12 = vpop.f32.mrf.mxu1  ;;  %v186_v0 = vadd.f32 %v2013_v3, %v168_v51  ;;  %v1532_v3 = vld [vmem:[%s2541_s3 + $0x170] sm:$0xf] }
  0xa2   :  { %v1533_v27 = vor.u32 %v1741_v18, %v1532_v3  ;;  %v1728_v18 = vld [vmem:[%s2541_s3 + $0x114] sm:$0xf] }
  0xa3   :  { %v194_v7 = vmax.f32 %v186_v0, 0.0  ;;  %v1482_v0 = vld [vmem:[%s2541_s3 + $0x120] sm:$0xf] }
  0xa5   :  { %v2057_v25 = vpop.f32.mrf.mxu3 }
  0xa6   :  { %v2073_v32 = vpop.f32.mrf.mxu0 }
  0xa7   :  { %v170_v23 = vadd.f32 %v2187_v33, %v2073_v32  ;;  %v1526_v32 = vld [vmem:[%s2541_s3 + $0x168] sm:$0xf0] }
  0xa8   :  { %v2068_v29 = vpop.f32.mrf.mxu2 }
  0xa9   :  { %v2081_v36 = vpop.f32.mrf.mxu1  ;;  %v236_v44 = vadd.f32 %v2187_v33, %v2068_v29  ;;  %v1713_v29 = vld [vmem:[%s2541_s3 + $0x94] sm:$0xf0]  ;;  %v188_v38 = vadd.f32 %v2031_v12, %v170_v23  ;;  %v1490_v12 = vld [vmem:[%s2541_s3 + $0x130] sm:$0xf] }
  0xaa   :  { %v1391_v55 = vor.u32 %v1713_v29, %v1390_v49  ;;  %v1516_v29 = vld [vmem:[%s2541_s3 + $0x150] sm:$0xf]  ;;  %v1491_v61 = vor.u32 %v1733_v46, %v1490_v12 }
  0xab   :  { %v254_v58 = vadd.f32 %v2015_v4, %v236_v44  ;;  %v1711_v4 = vld [vmem:[%s2541_s3 + $0x84] sm:$0xf0] }
  0xac   :  { %633 = vmatpush.bf16.msrb.mxu1 %v1391_v55  ;;  %v1383_v2 = vor.u32 %v1711_v4, %v1382_v10  ;;  %v1737_v55 = vld [vmem:[%s2541_s3 + $0x154] sm:$0xf0]  ;;  %v1730_v10 = vld [vmem:[%s2541_s3 + $0x124] sm:$0xf] }
  0xad   :  { %v2107_v50 = vpop.f32.mrf.mxu3  ;;  %v262_v5 = vmax.f32 %v254_v58, 0.0  ;;  %v1518_v58 = vld [vmem:[%s2541_s3 + $0x158] sm:$0xf0] }
  0xae   :  { %v2123_v57 = vpop.f32.mrf.mxu0 }
  0xaf   :  { %v265_v13 = vmax.f32 %v194_v7, %v262_v5  ;;  %v1735_v7 = vld [vmem:[%s2541_s3 + $0x144] sm:$0xf0]  ;;  %v173_v12 = vadd.f32 %v2187_v33, %v2123_v57 }
  0xb0   :  { %v2118_v54 = vpop.f32.mrf.mxu2  ;;  %634 = vmatpush.bf16.msrb.mxu1 %v1383_v2  ;;  %v1517_v2 = vor.u32 %v1737_v55, %v1516_v29  ;;  %v1576_v55 = vld [vmem:[%s2541_s3 + $0x1b8] sm:$0xf0] }
  0xb1   :  { %v192_v62 = vpop.f32.mrf.mxu1  ;;  %v238_v16 = vadd.f32 %v2187_v33, %v2118_v54  ;;  %v1534_v54 = vld [vmem:[%s2541_s3 + $0x178] sm:$0xf0] }
  0xb2   :  { %v1537_v28 = vor.u32 %v1740_v21, %v1534_v54  ;;  %v1474_v21 = vld [vmem:[%s2541_s3 + $0x110] sm:$0xf]  ;;  %v1729_v54 = vld [vmem:[%s2541_s3 + $0x114] sm:$0xf0] }
  0xb5   :  { %v260_v17 = vpop.f32.mrf.mxu3 }
  0xb6   :  { %v174_v26 = vpop.f32.mrf.mxu0 }
  0xb7   :  { %v256_v26 = vadd.f32 %v2057_v25, %v238_v16  ;;  %v1738_v25 = vld [vmem:[%s2541_s3 + $0x164] sm:$0xf] }
  0xb8   :  { %v2170_v22 = vpop.f32.mrf.mxu2  ;;  %v1529_v49 = vor.u32 %v1738_v25, %v1526_v32  ;;  %v1475_v25 = vor.u32 %v1729_v54, %v1474_v21  ;;  %v1726_v32 = vld [vmem:[%s2541_s3 + $0x104] sm:$0xf]  ;;  %v1560_v21 = vld [vmem:[%s2541_s3 + $0x198] sm:$0xf0]  ;;  %v1558_v54 = vld [vmem:[%s2541_s3 + $0x190] sm:$0xf] }
  0xb9   :  { %v306_v34 = vpop.f32.mrf.mxu1  ;;  %v263_v47 = vmax.f32 %v256_v26, 0.0 }
  0xba   :  { %v307_v52 = vadd.f32 %v2187_v33, %v306_v34 }
  0xbd   :  { %v324_v53 = vpop.f32.mrf.mxu3 }
  0xbe   :  { %v377_v59 = vpop.f32.mrf.mxu0  ;;  %v325_v1 = vadd.f32 %v324_v53, %v307_v52 }
  0xbf   :  { %v378_v6 = vadd.f32 %v2187_v33, %v377_v59  ;;  %v195_v59 = vmax.f32 %v188_v38, 0.0  ;;  %v1468_v38 = vld [vmem:[%s2541_s3 + $0x108] sm:$0xf0] }
  0xc0   :  { %v242_v56 = vpop.f32.mrf.mxu2  ;;  %v333_v8 = vmax.f32 %v325_v1, 0.0  ;;  %v1731_v1 = vld [vmem:[%s2541_s3 + $0x124] sm:$0xf0]  ;;  %v1471_v57 = vor.u32 %v1726_v32, %v1468_v38  ;;  %v1552_v32 = vld [vmem:[%s2541_s3 + $0x188] sm:$0xf0] }
  0xc1   :  { %v308_v62 = vpop.f32.mrf.mxu1  ;;  %v1736_v56 = vld [vmem:[%s2541_s3 + $0x154] sm:$0xf]  ;;  %v1483_v3 = vor.u32 %v1731_v1, %v1482_v0  ;;  %v1550_v38 = vld [vmem:[%s2541_s3 + $0x180] sm:$0xf] }
  0xc2   :  { %v336_v19 = vmax.f32 %v265_v13, %v333_v8  ;;  %v309_v31 = vadd.f32 %v2187_v33, %v308_v62  ;;  %v1484_v62 = vld [vmem:[%s2541_s3 + $0x128] sm:$0xf0]  ;;  %v1521_v5 = vor.u32 %v1736_v56, %v1518_v58  ;;  %v266_v8 = vmax.f32 %v195_v59, %v263_v47  ;;  %v1755_v47 = vld [vmem:[%s2541_s3 + $0x1e4] sm:$0xf0]  ;;  %v1749_v56 = vld [vmem:[%s2541_s3 + $0x1b4] sm:$0xf0] }
  0xc3   :  { %v1510_v13 = vld [vmem:[%s2541_s3 + $0x148] sm:$0xf0]  ;;  %v1487_v16 = vor.u32 %v1730_v10, %v1484_v62  ;;  %v1609_v59 = vor.u32 %v1755_v47, %v1608_v45  ;;  %v191_v10 = vadd.f32 %v2081_v36, %v173_v12  ;;  %v1764_v45 = vld [vmem:[%s2541_s3 + $0x234] sm:$0xf]  ;;  %v1660_v12 = vld [vmem:[%s2541_s3 + $0x238] sm:$0xf0] }
  0xc4   :  { %v1765_v47 = vld [vmem:[%s2541_s3 + $0x234] sm:$0xf0] }
  0xc5   :  { %v326_v9 = vpop.f32.mrf.mxu3 }
  0xc6   :  { %v379_v15 = vpop.f32.mrf.mxu0  ;;  %v327_v41 = vadd.f32 %v326_v9, %v309_v31  ;;  %v1756_v31 = vld [vmem:[%s2541_s3 + $0x1f4] sm:$0xf] }
  0xc7   :  { %v380_v43 = vadd.f32 %v2187_v33, %v379_v15 }
  0xc8   :  { %v395_v11 = vpop.f32.mrf.mxu2  ;;  %v334_v63 = vmax.f32 %v327_v41, 0.0  ;;  %v241_v41 = vadd.f32 %v2187_v33, %v2170_v22  ;;  %v1754_v22 = vld [vmem:[%s2541_s3 + $0x1e4] sm:$0xf] }
  0xc9   :  { %v396_v14 = vadd.f32 %v395_v11, %v378_v6  ;;  %v2238_v17 = vpop.f32.mrf.mxu1  ;;  %v1508_v6 = vld [vmem:[%s2541_s3 + $0x140] sm:$0xf]  ;;  %v1734_v11 = vld [vmem:[%s2541_s3 + $0x144] sm:$0xf] }
  0xca   :  { %v1513_v26 = vor.u32 %v1734_v11, %v1510_v13  ;;  %v259_v58 = vadd.f32 %v2107_v50, %v241_v41  ;;  %v1752_v50 = vld [vmem:[%s2541_s3 + $0x1d4] sm:$0xf]  ;;  %v1751_v13 = vld [vmem:[%s2541_s3 + $0x1c4] sm:$0xf0] }
  0xcb   :  { %v404_v20 = vmax.f32 %v396_v14, 0.0 }
  0xcd   :  { %v407_v24 = vmax.f32 %v336_v19, %v404_v20  ;;  %v2259_v35 = vpop.f32.mrf.mxu3  ;;  %v337_v19 = vmax.f32 %v266_v8, %v334_v63  ;;  %v1476_v20 = vld [vmem:[%s2541_s3 + $0x118] sm:$0xf0]  ;;  %v1753_v63 = vld [vmem:[%s2541_s3 + $0x1d4] sm:$0xf0]  ;;  %v1592_v8 = vld [vmem:[%s2541_s3 + $0x1c0] sm:$0xf] }
  0xce   :  { %v2277_v44 = vpop.f32.mrf.mxu0  ;;  %v1479_v37 = vor.u32 %v1728_v18, %v1476_v20  ;;  %v1744_v20 = vld [vmem:[%s2541_s3 + $0x194] sm:$0xf] }
  0xcf   :  { %v410_v34 = vpack.c.bf16 %v407_v24, %v407_v24  ;;  %v1509_v24 = vor.u32 %v1735_v7, %v1508_v6  ;;  %v383_v62 = vadd.f32 %v2187_v33, %v2277_v44  ;;  %v1746_v44 = vld [vmem:[%s2541_s3 + $0x1a4] sm:$0xf] }
  0xd0   :  { %v397_v39 = vpop.f32.mrf.mxu2 }
  0xd1   :  { %v432_v42 = vunpack.c.l.b16 %v410_v34  ;;  %1370 = vmatmul.msk.bf16.vlgmr.msra.gmra.mxu0 %vm475_vm2, %v410_v34  ;;  %1371 = vmatmul.msk.bf16.vlgmr.msra.gmra.mxu2 %vm475_vm2, %v410_v34  ;;  %v313_v51 = vpop.f32.mrf.mxu1  ;;  %v398_v53 = vadd.f32 %v397_v39, %v380_v43  ;;  %v1618_v34 = vld [vmem:[%s2541_s3 + $0x1f8] sm:$0xf0]  ;;  %v1466_v39 = vld [vmem:[%s2541_s3 + $0x100] sm:$0xf] }
  0xd2   :  { %876 = vmatpush.bf16.msra.mxu0 %v1533_v27  ;;  %889 = vmatpush.bf16.msra.mxu2 %v1537_v28  ;;  %v1616_v27 = vld [vmem:[%s2541_s3 + $0x1f0] sm:$0xf]  ;;  %v1621_v43 = vor.u32 %v1756_v31, %v1618_v34  ;;  %v1467_v29 = vor.u32 %v1727_v40, %v1466_v39  ;;  %v1748_v51 = vld [vmem:[%s2541_s3 + $0x1b4] sm:$0xf]  ;;  %v1563_v31 = vor.u32 %v1744_v20, %v1560_v21  ;;  %v1743_v39 = vld [vmem:[%s2541_s3 + $0x184] sm:$0xf0] }
  0xd3   :  { %v2291_v52 = vpack.c.b16 %v432_v42, %v432_v42  ;;  %v405_v9 = vmax.f32 %v398_v53, 0.0  ;;  %v1617_v42 = vor.u32 %v1757_v30, %v1616_v27  ;;  %v1579_v36 = vor.u32 %v1748_v51, %v1576_v55  ;;  %v1652_v51 = vld [vmem:[%s2541_s3 + $0x228] sm:$0xf0]  ;;  %v1763_v55 = vld [vmem:[%s2541_s3 + $0x224] sm:$0xf0] }
  0xd5   :  { %v434_v4 = vrot.slane %v2291_v52, 1  ;;  %v331_v14 = vpop.f32.mrf.mxu3  ;;  %v408_v28 = vmax.f32 %v337_v19, %v405_v9  ;;  %v583_v0 = vrot.slane %v2291_v52, 2  ;;  %v264_v52 = vmax.f32 %v259_v58, 0.0 }
  0xd6   :  { %877 = vmatpush.bf16.msra.mxu0 %v1525_v48  ;;  %890 = vmatpush.bf16.msra.mxu2 %v1529_v49  ;;  %v384_v23 = vpop.f32.mrf.mxu0  ;;  %v1610_v48 = vld [vmem:[%s2541_s3 + $0x1e8] sm:$0xf0]  ;;  %v312_v49 = vadd.f32 %v2187_v33, %v2238_v17  ;;  %v1574_v17 = vld [vmem:[%s2541_s3 + $0x1b0] sm:$0xf]  ;;  %v1750_v14 = vld [vmem:[%s2541_s3 + $0x1c4] sm:$0xf] }
  0xd7   :  { %1336 = vmatmul.msk.bf16.vlgmr.msra.gmra.mxu1 %vm475_vm2, %v434_v4  ;;  %1337 = vmatmul.msk.bf16.vlgmr.msra.gmra.mxu3 %vm475_vm2, %v434_v4  ;;  %v2374_v46 = vpack.c.bf16 %v408_v28, %v408_v28  ;;  %v1602_v4 = vld [vmem:[%s2541_s3 + $0x1d8] sm:$0xf0]  ;;  %v1575_v33 = vor.u32 %v1749_v56, %v1574_v17  ;;  %v1745_v23 = vld [vmem:[%s2541_s3 + $0x194] sm:$0xf0] }
  0xd8   :  { %v2329_v15 = vpop.f32.mrf.mxu2  ;;  %808 = vmatpush.bf16.msra.mxu3 %v1495_v60  ;;  %795 = vmatpush.bf16.msra.mxu1 %v1491_v61  ;;  %v1613_v60 = vor.u32 %v1754_v22, %v1610_v48  ;;  %v1600_v61 = vld [vmem:[%s2541_s3 + $0x1d0] sm:$0xf]  ;;  %v330_v1 = vadd.f32 %v2259_v35, %v312_v49  ;;  %v1747_v35 = vld [vmem:[%s2541_s3 + $0x1a4] sm:$0xf0]  ;;  %v1605_v7 = vor.u32 %v1752_v50, %v1602_v4  ;;  %v1758_v4 = vld [vmem:[%s2541_s3 + $0x204] sm:$0xf] }
  0xd9   :  { %v1601_v6 = vor.u32 %v1753_v63, %v1600_v61  ;;  %v745_v9 = vunpack.c.l.b16 %v2374_v46  ;;  %v401_v11 = vadd.f32 %v2329_v15, %v383_v62  ;;  %v1559_v34 = vor.u32 %v1745_v23, %v1558_v54  ;;  %v1642_v61 = vld [vmem:[%s2541_s3 + $0x210] sm:$0xf] }
  0xda   :  { %878 = vmatpush.bf16.msra.mxu0 %v1517_v2  ;;  %891 = vmatpush.bf16.msra.mxu2 %v1521_v5  ;;  %v1568_v2 = vld [vmem:[%s2541_s3 + $0x1a8] sm:$0xf0]  ;;  %v1566_v5 = vld [vmem:[%s2541_s3 + $0x1a0] sm:$0xf]  ;;  %v335_v18 = vmax.f32 %v330_v1, 0.0  ;;  %v1663_v49 = vor.u32 %v1764_v45, %v1660_v12 }
  0xdb   :  { %v1571_v15 = vor.u32 %v1746_v44, %v1568_v2  ;;  %v1567_v19 = vor.u32 %v1747_v35, %v1566_v5  ;;  %v746_v28 = vpack.c.b16 %v745_v9, %v745_v9  ;;  %v406_v30 = vmax.f32 %v401_v11, 0.0  ;;  %v1634_v1 = vld [vmem:[%s2541_s3 + $0x200] sm:$0xf] }
  0xdc   :  { %809 = vmatpush.bf16.msra.mxu3 %v1487_v16  ;;  %796 = vmatpush.bf16.msra.mxu1 %v1483_v3  ;;  %v1594_v16 = vld [vmem:[%s2541_s3 + $0x1c8] sm:$0xf0]  ;;  %v196_v3 = vmax.f32 %v191_v10, 0.0  ;;  %v1761_v10 = vld [vmem:[%s2541_s3 + $0x214] sm:$0xf0] }
  0xdd   :  { %v828_v40 = vrot.slane %v746_v28, 2  ;;  %v747_v48 = vrot.slane %v746_v28, 1  ;;  %v1643_v50 = vor.u32 %v1761_v10, %v1642_v61 }
  0xde   :  { %879 = vmatpush.bf16.msra.mxu0 %v1509_v24  ;;  %892 = vmatpush.bf16.msra.mxu2 %v1513_v26  ;;  %v1593_v24 = vor.u32 %v1751_v13, %v1592_v8  ;;  %v1597_v26 = vor.u32 %v1750_v14, %v1594_v16  ;;  %v267_v27 = vmax.f32 %v196_v3, %v264_v52 }
  0xe0   :  { %810 = vmatpush.bf16.msra.mxu3 %v1479_v37  ;;  %797 = vmatpush.bf16.msra.mxu1 %v1475_v25  ;;  %v402_v53 = vpop.f32.mrf.mxu2  ;;  %v1742_v37 = vld [vmem:[%s2541_s3 + $0x184] sm:$0xf]  ;;  %v338_v25 = vmax.f32 %v267_v27, %v335_v18 }
  0xe1   :  { %1454 = vmatmul.msk.bf16.vlgmr.msrb.gmra.mxu0 %vm475_vm2, %v2374_v46  ;;  %1455 = vmatmul.msk.bf16.vlgmr.msrb.gmra.mxu2 %vm475_vm2, %v2374_v46  ;;  %v1658_v46 = vld [vmem:[%s2541_s3 + $0x230] sm:$0xf]  ;;  %v1650_v53 = vld [vmem:[%s2541_s3 + $0x220] sm:$0xf] }
  0xe2   :  { %1040 = vmatpush.bf16.msrb.mxu0 %v1617_v42  ;;  %1053 = vmatpush.bf16.msrb.mxu2 %v1621_v43  ;;  %v409_v41 = vmax.f32 %v338_v25, %v406_v30  ;;  %v1555_v42 = vor.u32 %v1742_v37, %v1552_v32  ;;  %v1551_v43 = vor.u32 %v1743_v39, %v1550_v38 }
  0xe3   :  { %v1651_v58 = vor.u32 %v1763_v55, %v1650_v53  ;;  %v413_v55 = vld [vmem:[%s2542_s4] sm:$0x3] }
  0xe4   :  { %811 = vmatpush.bf16.msra.mxu3 %v1471_v57  ;;  %798 = vmatpush.bf16.msra.mxu1 %v1467_v29  ;;  %v412_v22 = vpack.c.bf16 %v409_v41, %v409_v41  ;;  %v1659_v57 = vor.u32 %v1765_v47, %v1658_v46  ;;  %v1762_v29 = vld [vmem:[%s2541_s3 + $0x224] sm:$0xf] }
  0xe5   :  { %v1655_v56 = vor.u32 %v1762_v29, %v1652_v51 }
  0xe6   :  { %1041 = vmatpush.bf16.msrb.mxu0 %v1609_v59  ;;  %1054 = vmatpush.bf16.msrb.mxu2 %v1613_v60  ;;  %v990_v17 = vunpack.c.l.b16 %v412_v22  ;;  %v1760_v59 = vld [vmem:[%s2541_s3 + $0x214] sm:$0xf]  ;;  %v1644_v60 = vld [vmem:[%s2541_s3 + $0x218] sm:$0xf0] }
  0xe7   :  { %1412 = vmatmul.msk.bf16.vlgmr.msrb.gmra.mxu1 %vm475_vm2, %v583_v0  ;;  %1413 = vmatmul.msk.bf16.vlgmr.msrb.gmra.mxu3 %vm475_vm2, %v583_v0  ;;  %v1647_v63 = vor.u32 %v1760_v59, %v1644_v60  ;;  %v1636_v0 = vld [vmem:[%s2541_s3 + $0x208] sm:$0xf0]  ;;  %v1147_v60 = vperm.slane %v413_v55, 1 }
  0xe8   :  { %969 = vmatpush.bf16.msrb.mxu3 %v1579_v36  ;;  %956 = vmatpush.bf16.msrb.mxu1 %v1575_v33  ;;  %v991_v62 = vpack.c.b16 %v990_v17, %v990_v17  ;;  %v1759_v36 = vld [vmem:[%s2541_s3 + $0x204] sm:$0xf0]  ;;  %v1639_v44 = vor.u32 %v1758_v4, %v1636_v0 }
  0xe9   :  { %v1635_v2 = vor.u32 %v1759_v36, %v1634_v1 }
  0xea   :  { %1042 = vmatpush.bf16.msrb.mxu0 %v1601_v6  ;;  %1055 = vmatpush.bf16.msrb.mxu2 %v1605_v7  ;;  %v992_v33 = vrot.slane %v991_v62, 1  ;;  %v1073_v5 = vrot.slane %v991_v62, 2 }
  0xec   :  { %970 = vmatpush.bf16.msrb.mxu3 %v1571_v15  ;;  %957 = vmatpush.bf16.msrb.mxu1 %v1567_v19 }
  0xee   :  { %1043 = vmatpush.bf16.msrb.mxu0 %v1593_v24  ;;  %1056 = vmatpush.bf16.msrb.mxu2 %v1597_v26 }
  0xf0   :  { %971 = vmatpush.bf16.msrb.mxu3 %v1563_v31  ;;  %958 = vmatpush.bf16.msrb.mxu1 %v1559_v34 }
  0xf1   :  { %1538 = vmatmul.msk.bf16.vlgmr.msra.gmra.mxu0 %vm475_vm2, %v828_v40  ;;  %1539 = vmatmul.msk.bf16.vlgmr.msra.gmra.mxu2 %vm475_vm2, %v828_v40 }
  0xf4   :  { %972 = vmatpush.bf16.msrb.mxu3 %v1555_v42  ;;  %959 = vmatpush.bf16.msrb.mxu1 %v1551_v43 }
  0xf7   :  { %1496 = vmatmul.msk.bf16.vlgmr.msra.gmra.mxu1 %vm475_vm2, %v747_v48  ;;  %1497 = vmatmul.msk.bf16.vlgmr.msra.gmra.mxu3 %vm475_vm2, %v747_v48 }
  0xf8   :  { %1134 = vmatpush.bf16.msra.mxu3 %v1663_v49  ;;  %1121 = vmatpush.bf16.msra.mxu1 %v1659_v57 }
  0xfc   :  { %1135 = vmatpush.bf16.msra.mxu3 %v1655_v56  ;;  %1122 = vmatpush.bf16.msra.mxu1 %v1651_v58  ;;  %v1146_v58 = vperm.slane %v413_v55, 0 }
 0x100   :  { %1136 = vmatpush.bf16.msra.mxu3 %v1647_v63  ;;  %1123 = vmatpush.bf16.msra.mxu1 %v1643_v50 }
 0x101   :  { %1622 = vmatmul.msk.bf16.vlgmr.msrb.gmra.mxu0 %vm475_vm2, %v992_v33  ;;  %1623 = vmatmul.msk.bf16.vlgmr.msrb.gmra.mxu2 %vm475_vm2, %v992_v33 }
 0x104   :  { %1137 = vmatpush.bf16.msra.mxu3 %v1639_v44  ;;  %1124 = vmatpush.bf16.msra.mxu1 %v1635_v2 }
 0x107   :  { %1580 = vmatmul.msk.bf16.vlgmr.msrb.gmra.mxu1 %vm475_vm2, %v412_v22  ;;  %1581 = vmatmul.msk.bf16.vlgmr.msrb.gmra.mxu3 %vm475_vm2, %v412_v22 }
 0x117   :  { %1664 = vmatmul.msk.bf16.vlgmr.msra.gmra.mxu1 %vm475_vm2, %v1073_v5  ;;  %1665 = vmatmul.msk.bf16.vlgmr.msra.gmra.mxu3 %vm475_vm2, %v1073_v5 }
 0x14e   :  { %v557_v35 = vpop.f32.mrf.mxu0 }
 0x154   :  { %v488_v52 = vpop.f32.mrf.mxu1  ;;  %v570_v6 = vpop.f32.mrf.mxu2 }
 0x155   :  { %v558_v32 = vadd.f32 %v557_v35, %v488_v52 }
 0x156   :  { %v559_v7 = vpop.f32.mrf.mxu0 }
 0x15a   :  { %v501_v8 = vpop.f32.mrf.mxu3 }
 0x15b   :  { %v571_v39 = vadd.f32 %v570_v6, %v501_v8 }
 0x15c   :  { %v490_v9 = vpop.f32.mrf.mxu1  ;;  %v572_v11 = vpop.f32.mrf.mxu2 }
 0x15e   :  { %v716_v13 = vpop.f32.mrf.mxu0 }
 0x162   :  { %v503_v14 = vpop.f32.mrf.mxu3 }
 0x164   :  { %v636_v16 = vpop.f32.mrf.mxu1  ;;  %v729_v3 = vpop.f32.mrf.mxu2 }
 0x165   :  { %v653_v40 = vadd.f32 %v636_v16, %v558_v32 }
 0x166   :  { %v718_v18 = vpop.f32.mrf.mxu0 }
 0x167   :  { %v733_v43 = vadd.f32 %v716_v13, %v653_v40 }
 0x16a   :  { %v649_v15 = vpop.f32.mrf.mxu3 }
 0x16b   :  { %v654_v41 = vadd.f32 %v649_v15, %v571_v39 }
 0x16c   :  { %v638_v19 = vpop.f32.mrf.mxu1  ;;  %v731_v20 = vpop.f32.mrf.mxu2 }
 0x16d   :  { %v734_v47 = vadd.f32 %v729_v3, %v654_v41 }
 0x16e   :  { %v881_v21 = vpop.f32.mrf.mxu0 }
 0x172   :  { %v651_v54 = vpop.f32.mrf.mxu3 }
 0x174   :  { %v800_v23 = vpop.f32.mrf.mxu1  ;;  %v894_v24 = vpop.f32.mrf.mxu2 }
 0x175   :  { %v817_v46 = vadd.f32 %v800_v23, %v733_v43 }
 0x176   :  { %v883_v26 = vpop.f32.mrf.mxu0 }
 0x177   :  { %v898_v48 = vadd.f32 %v881_v21, %v817_v46 }
 0x17a   :  { %v813_v27 = vpop.f32.mrf.mxu3 }
 0x17b   :  { %v818_v22 = vadd.f32 %v813_v27, %v734_v47 }
 0x17c   :  { %v802_v28 = vpop.f32.mrf.mxu1  ;;  %v896_v30 = vpop.f32.mrf.mxu2 }
 0x17d   :  { %v899_v29 = vadd.f32 %v894_v24, %v818_v22 }
 0x17e   :  { %v1045_v31 = vpop.f32.mrf.mxu0 }
 0x182   :  { %v815_v34 = vpop.f32.mrf.mxu3 }
 0x184   :  { %v961_v37 = vpop.f32.mrf.mxu1  ;;  %v1058_v25 = vpop.f32.mrf.mxu2 }
 0x185   :  { %v978_v57 = vadd.f32 %v961_v37, %v898_v48 }
 0x186   :  { %v1047_v38 = vpop.f32.mrf.mxu0 }
 0x187   :  { %v1062_v17 = vadd.f32 %v1045_v31, %v978_v57 }
 0x18a   :  { %v974_v42 = vpop.f32.mrf.mxu3 }
 0x18b   :  { %v979_v53 = vadd.f32 %v974_v42, %v899_v29 }
 0x18c   :  { %v963_v45 = vpop.f32.mrf.mxu1  ;;  %v1060_v12 = vpop.f32.mrf.mxu2 }
 0x18d   :  { %v1063_v59 = vadd.f32 %v1058_v25, %v979_v53 }
 0x192   :  { %v976_v49 = vpop.f32.mrf.mxu3 }
 0x194   :  { %v1126_v51 = vpop.f32.mrf.mxu1 }
 0x195   :  { %v1143_v56 = vadd.f32 %v1126_v51, %v1062_v17 }
 0x197   :  { %v1150_v63 = vadd.f32 %v1146_v58, %v1143_v56 }
 0x199   :  { %v1152_v0 = vmax.f32 %v1150_v63, 0.0 }
 0x19a   :  { %v1139_v61 = vpop.f32.mrf.mxu3 }
 0x19b   :  { %v1144_v10 = vadd.f32 %v1139_v61, %v1063_v59 }
 0x19c   :  { %v1128_v62 = vpop.f32.mrf.mxu1 }
 0x19d   :  { %v1151_v50 = vadd.f32 %v1147_v60, %v1144_v10 }
 0x19f   :  { %v1153_v4 = vmax.f32 %v1151_v50, 0.0 }
 0x1a1   :  { %v1156_v1 = vrot.slane %v1153_v4, 6 }
 0x1a2   :  { %v1141_v36 = vpop.f32.mrf.mxu3 }
 0x1a3   :  { %v1157_v33 = vsel %vm154_vm0, %v1152_v0, %v1156_v1 }
 0x1a4   :  { %1159 = vst [vmem:[%s2543_s5] sm:$0xf] %v1157_v33 }

</bundles_post_ra>
